<compile_context>
chip_gen: v6e
topology: v6e:2x2x1
jax: 0.10.0
libtpu: 0.0.40
codegen_flags: <defaults>
</compile_context>

<pallas_src>
import jax
import jax.numpy as jnp
from jax import lax
from jax.experimental import pallas as pl
from jax.experimental.pallas import tpu as pltpu


def _round_up(n, m):
    return ((n + m - 1) // m) * m


def _context_gating_kernel(x_ref, w_ref, b_ref, o_ref):
    # x_ref: (TM, C)  input tile (native dtype, fed straight to the MXU)
    # w_ref: (C, C)   weight in PyTorch layout W[out, in] (VMEM-resident)
    # b_ref: (1, C)   bias row (VMEM-resident)
    # o_ref: (TM, C)  output tile
    x = x_ref[...]
    # x @ W.T : contract x's feature axis with W's *second* axis on the MXU,
    # f32 accumulation, no operand upcast and no host-side transpose.
    logits = lax.dot_general(
        x,
        w_ref[...],
        dimension_numbers=(((1,), (1,)), ((), ())),
        preferred_element_type=jnp.float32,
    )
    gate = jax.nn.sigmoid(logits + b_ref[...].astype(jnp.float32))
    # gate (f32) * x (native) -> promoted product, cast once on store.
    o_ref[...] = (gate * x).astype(o_ref.dtype)


def context_gating(x, W, b, *, tm_max=1024, vmem_budget_bytes=24 * 1024 * 1024):
    """sigmoid(x @ W.T + b) * x  with x: (..., c), W: (c, c), b: (c,)."""
    orig_shape = x.shape
    c = orig_shape[-1]
    x2d = x.reshape(-1, c)
    m = x2d.shape[0]

    # --- lane-dense channel axis: pad C to a multiple of 128 ----------------
    c_pad = _round_up(c, 128)
    if c_pad != c:
        x2d = jnp.pad(x2d, ((0, 0), (0, c_pad - c)))
        W = jnp.pad(W, ((0, c_pad - c), (0, c_pad - c)))
        b = jnp.pad(b, (0, c_pad - c))
    b2d = b.reshape(1, c_pad)

    # --- pick a row tile that fits the VMEM budget ---------------------------
    x_item = jnp.dtype(x.dtype).itemsize
    w_item = jnp.dtype(W.dtype).itemsize
    weight_bytes = c_pad * c_pad * w_item
    per_row_bytes = 4 * c_pad * x_item           # 2x input + 2x output buffers
    avail = max(vmem_budget_bytes - 2 * weight_bytes, 1 << 20)
    tm = max(8, min(tm_max, (avail // per_row_bytes) // 8 * 8))
    tm = min(tm, _round_up(m, 8))

    # Pad rows so the grid divides evenly (rows are independent; padded rows
    # compute garbage-free zeros and are sliced off afterwards).
    m_pad = _round_up(m, tm)
    if m_pad != m:
        x2d = jnp.pad(x2d, ((0, m_pad - m), (0, 0)))

    vmem_est = 2 * weight_bytes + 4 * tm * c_pad * x_item + 2 * c_pad * x_item
    vmem_limit = int(min(64 * 1024 * 1024,
                         max(32 * 1024 * 1024, 2 * vmem_est)))

    out = pl.pallas_call(
        _context_gating_kernel,
        out_shape=jax.ShapeDtypeStruct((m_pad, c_pad), x.dtype),
        grid_spec=pltpu.PrefetchScalarGridSpec(
            num_scalar_prefetch=0,
            grid=(m_pad // tm,),
            in_specs=[
                pl.BlockSpec((tm, c_pad), lambda i: (i, 0)),     # x tile
                pl.BlockSpec((c_pad, c_pad), lambda i: (0, 0)),  # W (resident)
                pl.BlockSpec((1, c_pad), lambda i: (0, 0)),      # b (resident)
            ],
            out_specs=pl.BlockSpec((tm, c_pad), lambda i: (i, 0)),
        ),
        compiler_params=pltpu.CompilerParams(
            # Row axis is embarrassingly parallel -> megacore sharding on v7x.
            dimension_semantics=("parallel",),
            vmem_limit_bytes=vmem_limit,
        ),
    )(x2d, W, b2d)

    out = out[:m, :c]
    return out.reshape(orig_shape)


def reference(x, W, b):
    # Pure-JAX reference matching F.linear: x @ W.T + b
    gate = jax.nn.sigmoid(jnp.einsum("...i,oi->...o", x, W) + b)
    return gate * x


if __name__ == "__main__":
    key = jax.random.PRNGKey(0)
    k_x, k_w = jax.random.split(key)

    # Small shapes: batch=2, seq=8, channels c=32  (x shape (..., c))
    batch, seq, c = 2, 8, 32
    x = jax.random.normal(k_x, (batch, seq, c), dtype=jnp.float32)

    # Deterministic xavier_uniform init for W (gain=1): U(-a, a), a = sqrt(6/(c+c))
    bound = (6.0 / (c + c)) ** 0.5
    W = jax.random.uniform(k_w, (c, c), dtype=jnp.float32,
                           minval=-bound, maxval=bound)
    b = jnp.zeros((c,), dtype=jnp.float32)

    out = context_gating(x, W, b)
    out = jax.block_until_ready(out)

    ref = reference(x, W, b)
    assert out.shape == x.shape
    assert jnp.allclose(out, ref, atol=1e-5, rtol=1e-5), "mismatch vs reference"

    print("KERNEL_OK")
</pallas_src>

<mosaic_0001>
module attributes {stable_mosaic.version = 11 : i64} {
  func.func @_context_gating_kernel(%arg0: i32, %arg1: memref<16x128xf32, #tpu.memory_space<vmem>>, %arg2: memref<128x128xf32, #tpu.memory_space<vmem>>, %arg3: memref<1x128xf32, #tpu.memory_space<vmem>>, %arg4: memref<16x128xf32, #tpu.memory_space<vmem>>) attributes {dimension_semantics = [#tpu.dimension_semantics<parallel>], iteration_bounds = array<i64: 1>, scalar_prefetch = 0 : i64, scratch_operands = 0 : i64, tpu.core_type = #tpu.core_type<tc>, window_params = [{transform_indices = @transform_0, window_bounds = array<i64: 16, 128>}, {pipeline_mode = #tpu.pipeline_mode<synchronous>, transform_indices = @transform_1, window_bounds = array<i64: 128, 128>}, {pipeline_mode = #tpu.pipeline_mode<synchronous>, transform_indices = @transform_2, window_bounds = array<i64: 1, 128>}, {transform_indices = @transform_3, window_bounds = array<i64: 16, 128>}]} {
    %c0 = arith.constant 0 : index
    %c0_0 = arith.constant 0 : index
    %0 = vector.load %arg1[%c0, %c0_0] : memref<16x128xf32, #tpu.memory_space<vmem>>, vector<16x128xf32>
    %c0_1 = arith.constant 0 : index
    %c0_2 = arith.constant 0 : index
    %1 = vector.load %arg2[%c0_1, %c0_2] : memref<128x128xf32, #tpu.memory_space<vmem>>, vector<128x128xf32>
    %cst = arith.constant dense<0.000000e+00> : vector<16x128xf32>
    %2 = tpu.matmul %0, %1, %cst {dimension_numbers = #tpu.dot_dimension_numbers<[1], [1], [0], [0], [0, 0, 1, 0], [], []>} : vector<16x128xf32>, vector<128x128xf32>, vector<16x128xf32> -> vector<16x128xf32>
    %c0_3 = arith.constant 0 : index
    %c0_4 = arith.constant 0 : index
    %3 = vector.load %arg3[%c0_3, %c0_4] : memref<1x128xf32, #tpu.memory_space<vmem>>, vector<1x128xf32>
    %4 = vector.broadcast %3 : vector<1x128xf32> to vector<16x128xf32>
    %5 = arith.addf %2, %4 : vector<16x128xf32>
    %6 = arith.negf %5 : vector<16x128xf32>
    %7 = math.exp %6 : vector<16x128xf32>
    %cst_5 = arith.constant 1.000000e+00 : f32
    %8 = vector.broadcast %cst_5 : f32 to vector<16x128xf32>
    %9 = arith.addf %8, %7 : vector<16x128xf32>
    %10 = arith.divf %8, %9 : vector<16x128xf32>
    %11 = arith.mulf %10, %0 : vector<16x128xf32>
    %c0_6 = arith.constant 0 : index
    %c0_7 = arith.constant 0 : index
    %12 = vector.load %arg4[%c0_6, %c0_7] : memref<16x128xf32, #tpu.memory_space<vmem>>, vector<16x128xf32>
    tpu.vector_store %arg4[%c0_6, %c0_7], %11 {strides = array<i32>} : memref<16x128xf32, #tpu.memory_space<vmem>>, vector<16x128xf32>,
    return
  }
  func.func @transform_0(%arg0: i32) -> (i32, i32) {
    %c0_i32 = arith.constant 0 : i32
    %c0_i32_0 = arith.constant 0 : i32
    return %arg0, %c0_i32 : i32, i32
  }
  func.func @transform_1(%arg0: i32) -> (i32, i32) {
    %c0_i32 = arith.constant 0 : i32
    %c0_i32_0 = arith.constant 0 : i32
    %c0_i32_1 = arith.constant 0 : i32
    return %c0_i32, %c0_i32_0 : i32, i32
  }
  func.func @transform_2(%arg0: i32) -> (i32, i32) {
    %c0_i32 = arith.constant 0 : i32
    %c0_i32_0 = arith.constant 0 : i32
    %c0_i32_1 = arith.constant 0 : i32
    return %c0_i32, %c0_i32_0 : i32, i32
  }
  func.func @transform_3(%arg0: i32) -> (i32, i32) {
    %c0_i32 = arith.constant 0 : i32
    %c0_i32_0 = arith.constant 0 : i32
    return %arg0, %c0_i32 : i32, i32
  }
}

</mosaic_0001>

<bundles_post_ra>
// kernel: tpu_custom_call.1
= control target key start
LH: loop header
LB: loop body
LE: loop exit
PB: predicated region body
PF: predicated region fallthrough
CT: control target
= control target key end

     0   :  { %8 = vsyncpa [#allocation3], 0  ;;  %s362_s0 = inlined_call_operand.hbm [shape: f32[16,128], index: 0, kind: input, shape index: {}]   ;;  %s363_s1 = inlined_call_operand.hbm [shape: f32[128,128], index: 1, kind: input, shape index: {}]   ;;  %s364_s2 = inlined_call_operand.vmem [shape: f32[1,128], index: 2, kind: input, shape index: {}]   ;;  %s365_s3 = inlined_call_operand.hbm [shape: f32[16,128], index: 3, kind: output, shape index: {}]  }
   0x1   :  { %9 = vsyncpa [#allocation6], 0 }
   0x2   :  { %10 = vsyncpa [#allocation4], 0  ;;  %s312_s12 = smov [#allocation2]  }
   0x3   :  { %s16_s13 = sshll.u32 %s312_s12, 4  ;;  %s17_s13 = int_to_ptr.vmem [resolvable:$true] %s16_s13 }
   0x4   :  { %s254_s14 = scalar_lea.vmem %s17_s13, 256  ;;  %p259_p1 = scmp.lt.s32.totalorder %s17_s13, %s17_s13 }
   0x5   :  { %p255_p0 = scmp.ne.s32.totalorder %s17_s13, %s254_s14  ;;  %p260_p2 = scmp.lt.s32.totalorder %s254_s14, %s254_s14 }
   0x7   :  { %p261_p3 = por %p260_p2, %p259_p1 }
   0x9   :  { %p262_p4 = pnand %p261_p3, %p255_p0 }
   0xb   :  { %265 = shalt.err (!%p262_p4)
}
   0xc   :  { %s313_s15 = smov 128   ;;  %s314_s16 = smov 8  }
   0xd   :  { %22 = dma.hbm_to_vmem [thread:$0]  %s362_s0, 256, %s17_s13, [#allocation3], %s313_s15, %s313_s15, %s314_s16  }
   0xe   :  { %s315_s19 = smov [#allocation5]  }
   0xf   :  { %s28_s20 = sshll.u32 %s315_s19, 4  ;;  %s29_s20 = int_to_ptr.vmem [resolvable:$true] %s28_s20 }
  0x10   :  { %s274_s21 = scalar_lea.vmem %s29_s20, 2048  ;;  %p279_p6 = scmp.lt.s32.totalorder %s29_s20, %s29_s20 }
  0x11   :  { %p275_p5 = scmp.ne.s32.totalorder %s29_s20, %s274_s21  ;;  %p280_p7 = scmp.lt.s32.totalorder %s274_s21, %s274_s21 }
  0x13   :  { %p281_p8 = por %p280_p7, %p279_p6 }
  0x15   :  { %p282_p9 = pnand %p281_p8, %p275_p5 }
  0x17   :  { %285 = shalt.err (!%p282_p9)
}
  0x18   :  { %34 = dma.hbm_to_vmem [thread:$0]  %s363_s1, 2048, %s29_s20, [#allocation6], %s313_s15, %s313_s15, %s314_s16  }
  0x19   :  { %306 = dma.done.wait [#allocation3], 256  }
  0x1a   :  { %307 = vsyncadd [#allocation3], 4294967040 }
  0x1b   :  { %308 = dma.done.wait [#allocation6], 2048  }
  0x1c   :  { %309 = vsyncadd [#allocation6], 4294965248  ;;  %v60_v0 = vld [vmem:[#allocation5 + $0x78] sm:$0xff]  ;;  %v59_v1 = vld [vmem:[#allocation5 + $0x70] sm:$0xff]  ;;  %s316_s24 = smov [#allocation7]  }
  0x1d   :  { %198 = vmatprep.subr.mxu0 %v60_v0  ;;  %v58_v2 = vld [vmem:[#allocation5 + $0x68] sm:$0xff]  ;;  %v349_v3 = vld [vmem:[#allocation2] sm:$0xff]  ;;  %v57_v4 = vld [vmem:[#allocation5 + $0x60] sm:$0xff]  ;;  %s164_s25 = sshll.u32 %s316_s24, 4  ;;  %s165_s25 = int_to_ptr.vmem [resolvable:$true] %s164_s25 }
  0x1e   :  { %199 = vmatpush3.xpose.msra.mxu0 %v60_v0  ;;  %230 = vmatprep.mubr.f32.mxu0 %v349_v3  ;;  %v56_v5 = vld [vmem:[#allocation5 + $0x58] sm:$0xff]  ;;  %v55_v6 = vld [vmem:[#allocation5 + $0x50] sm:$0xff]  ;;  %v54_v7 = vld [vmem:[#allocation5 + $0x48] sm:$0xff]  ;;  %p291_p11 = scmp.lt.s32.totalorder %s165_s25, %s165_s25 }
  0x1f   :  { %200 = vmatprep.subr.mxu0 %v59_v1  ;;  %v53_v8 = vld [vmem:[#allocation5 + $0x40] sm:$0xff]  ;;  %v52_v9 = vld [vmem:[#allocation5 + $0x38] sm:$0xff]  ;;  %v51_v10 = vld [vmem:[#allocation5 + $0x30] sm:$0xff] }
  0x20   :  { %v50_v11 = vld [vmem:[#allocation5 + $0x28] sm:$0xff]  ;;  %v49_v12 = vld [vmem:[#allocation5 + $0x20] sm:$0xff]  ;;  %v48_v13 = vld [vmem:[#allocation5 + $0x18] sm:$0xff] }
  0x21   :  { %v47_v14 = vld [vmem:[#allocation5 + $0x10] sm:$0xff]  ;;  %v46_v15 = vld [vmem:[#allocation5 + $0x8] sm:$0xff]  ;;  %v45_v16 = vld [vmem:[#allocation5] sm:$0xff] }
  0x22   :  { %201 = vmatpush3.xpose.msra.mxu0 %v59_v1  ;;  %v44_v17 = vld [vmem:[#allocation2 + $0x8] sm:$0xff]  ;;  %v177_v18 = vld [vmem:[%s364_s2] ss:$0 sm:$0xff]  ;;  %s286_s2 = scalar_lea.vmem %s165_s25, 256 }
  0x23   :  { %202 = vmatprep.subr.mxu0 %v58_v2  ;;  %p287_p10 = scmp.ne.s32.totalorder %s165_s25, %s286_s2  ;;  %p292_p12 = scmp.lt.s32.totalorder %s286_s2, %s286_s2 }
  0x25   :  { %p293_p13 = por %p292_p12, %p291_p11 }
  0x26   :  { %203 = vmatpush3.xpose.msra.mxu0 %v58_v2 }
  0x27   :  { %204 = vmatprep.subr.mxu0 %v57_v4  ;;  %p294_p0 = pnand %p293_p13, %p287_p10 }
  0x2a   :  { %205 = vmatpush3.xpose.msra.mxu0 %v57_v4 }
  0x2b   :  { %206 = vmatprep.subr.mxu0 %v56_v5 }
  0x2e   :  { %207 = vmatpush3.xpose.msra.mxu0 %v56_v5 }
  0x2f   :  { %208 = vmatprep.subr.mxu0 %v55_v6 }
  0x32   :  { %209 = vmatpush3.xpose.msra.mxu0 %v55_v6 }
  0x33   :  { %210 = vmatprep.subr.mxu0 %v54_v7 }
  0x36   :  { %211 = vmatpush3.xpose.msra.mxu0 %v54_v7 }
  0x37   :  { %212 = vmatprep.subr.mxu0 %v53_v8 }
  0x3a   :  { %213 = vmatpush3.xpose.msra.mxu0 %v53_v8 }
  0x3b   :  { %214 = vmatprep.subr.mxu0 %v52_v9 }
  0x3e   :  { %215 = vmatpush3.xpose.msra.mxu0 %v52_v9 }
  0x3f   :  { %216 = vmatprep.subr.mxu0 %v51_v10 }
  0x42   :  { %217 = vmatpush3.xpose.msra.mxu0 %v51_v10 }
  0x43   :  { %218 = vmatprep.subr.mxu0 %v50_v11 }
  0x46   :  { %219 = vmatpush3.xpose.msra.mxu0 %v50_v11 }
  0x47   :  { %220 = vmatprep.subr.mxu0 %v49_v12 }
  0x4a   :  { %221 = vmatpush3.xpose.msra.mxu0 %v49_v12 }
  0x4b   :  { %222 = vmatprep.subr.mxu0 %v48_v13 }
  0x4e   :  { %223 = vmatpush3.xpose.msra.mxu0 %v48_v13 }
  0x4f   :  { %224 = vmatprep.subr.mxu0 %v47_v14 }
  0x52   :  { %225 = vmatpush3.xpose.msra.mxu0 %v47_v14 }
  0x53   :  { %226 = vmatprep.subr.mxu0 %v46_v15 }
  0x56   :  { %227 = vmatpush3.xpose.msra.mxu0 %v46_v15 }
  0x57   :  { %228 = vmatprep.subr.mxu0 %v45_v16 }
  0x5a   :  { %229 = vmatpush3.xpose.msra.mxu0 %v45_v16 }
  0x5d   :  { %231 = vmatmul.mubr.f32.vlgmr.msra.gmra.mxu0 %v44_v17 }
 0x11d   :  { %v232_v19 = vpop.f32.mrf.mxu0 }
 0x11e   :  { %v140_v20 = vadd.f32 %v232_v19, %v177_v18 }
 0x11f   :  { %v134_v21 = vpop.f32.mrf.mxu0 }
 0x120   :  { %v179_v22 = vmul.f32 -1.442695, %v140_v20  ;;  %v135_v23 = vadd.f32 %v177_v18, %v134_v21 }
 0x122   :  { %238 = vpow2.f32 %v179_v22  ;;  %v178_v24 = vmul.f32 -1.442695, %v135_v23 }
 0x124   :  { %240 = vpow2.f32 %v178_v24 }
 0x12f   :  { %v239_v25 = vpop.eup %238 }
 0x130   :  { %v150_v26 = vadd.f32 1.0, %v239_v25 }
 0x131   :  { %v241_v27 = vpop.eup %240 }
 0x132   :  { %242 = vrcp.f32 %v150_v26  ;;  %v149_v28 = vadd.f32 1.0, %v241_v27 }
 0x134   :  { %244 = vrcp.f32 %v149_v28 }
 0x13f   :  { %v243_v29 = vpop.eup %242 }
 0x140   :  { %v156_v30 = vmul.f32 %v243_v29, %v44_v17 }
 0x141   :  { %v245_v31 = vpop.eup %244 }
 0x142   :  { %v155_v32 = vmul.f32 %v245_v31, %v349_v3  ;;  %158 = vst [vmem:[#allocation7 + $0x8] sm:$0xff] %v156_v30 }
 0x144   :  { %157 = vst [vmem:[#allocation7] sm:$0xff] %v155_v32 }
 0x145   :  { %297 = shalt.err (!%p294_p0)
}
 0x146   :  { %170 = dma.vmem_to_hbm [thread:$0]  %s165_s25, 256, %s365_s3, [#allocation4], %s313_s15, %s313_s15, %s314_s16  }
 0x147   :  { %310 = dma.done.wait [#allocation4], 256  }
 0x148   :  { %311 = vsyncadd [#allocation4], 4294967040 }
 0x149   :  { %174 = vsyncpa [#allocation3], 1 }
 0x14a   :  { %175 = vsyncpa [#allocation6], 1 }
 0x14b   :  { %176 = vsyncpa [#allocation4], 1 }

</bundles_post_ra>
